<compile_context>
chip_gen: v5e
topology: v5e:2x2
jax: 0.10.0
libtpu: 0.0.40
codegen_flags: <defaults>
</compile_context>

<pallas_src>
import jax
import jax.numpy as jnp
from jax.experimental import pallas as pl
from jax.experimental.pallas import tpu as pltpu

_LANE = 128   # vreg lane width


def _round_up(n, m):
    return ((n + m - 1) // m) * m


# ----------------------------- kernel ------------------------------------------------
def _fused_affine_kernel(x_ref, w_ref, b_ref, out_ref, acc_ref):
    """One (M, N, K) grid step of  y = x @ W_fused + b_fused  with f32 accumulation."""
    k = pl.program_id(2)

    @pl.when(k == 0)
    def _():
        acc_ref[...] = jnp.zeros_like(acc_ref)

    # Cast the x tile to the weight's compute dtype in-VMEM (cheap VPU cast) instead of
    # materializing a casted copy of x in HBM in the wrapper.
    acc_ref[...] += jnp.dot(x_ref[...].astype(w_ref.dtype), w_ref[...],
                            preferred_element_type=jnp.float32)

    @pl.when(k == pl.num_programs(2) - 1)
    def _():
        out_ref[...] = (acc_ref[...] + b_ref[...]).astype(out_ref.dtype)


# ----------------------------- one-time parameter prep -------------------------------
def prepare_fused_params(w1, b1, w2, b2, w3, b3, *, compute_dtype=jnp.bfloat16):
    """Fold the activation-free 3-layer stack into a single affine map, pad the output
    feature dim to a lane multiple (128) and cast the weight to the MXU compute dtype.

    Call ONCE when parameters change (this is hoisted out of the per-forward path).
    Returns (w_fused_padded, b_fused_padded, out_size).

    NOTE: folding and then casting to bf16 can lose more precision than three bf16
    layers for large hidden sizes; pass compute_dtype=jnp.float32 if accuracy matters.
    """
    f32 = jnp.float32
    w1f, w2f, w3f = w1.astype(f32), w2.astype(f32), w3.astype(f32)
    b1f, b2f, b3f = b1.astype(f32), b2.astype(f32), b3.astype(f32)
    w_fused = w1f @ w2f @ w3f                    # (in_size, out_size)
    b_fused = (b1f @ w2f + b2f) @ w3f + b3f      # (1, out_size)

    out_size = w3.shape[1]
    out_p = _round_up(out_size, _LANE)
    w_p = jnp.pad(w_fused, ((0, 0), (0, out_p - out_size))).astype(compute_dtype)
    b_p = jnp.pad(b_fused, ((0, 0), (0, out_p - out_size)))   # stays f32 (added to f32 acc)
    return w_p, b_p, out_size


# ----------------------------- tiling / VMEM heuristics -------------------------------
def _vmem_ceiling_bytes():
    cap = 64 << 20   # conservative fallback = v7x physical VMEM per TensorCore
    try:
        info = pltpu.get_tpu_info()
        cap = int(getattr(info, "vmem_capacity_bytes", cap)) or cap
    except Exception:
        pass
    # ~75% of physical: ~96 MiB on v5e/v6e (128 MiB), ~48 MiB on v7x (64 MiB).
    return (cap * 3) // 4


def _divisor_tiles(total, cands):
    """Tile sizes that divide `total` exactly, largest first (total itself included)."""
    out = []
    for c in (total,) + cands:
        if c <= total and total % c == 0 and c not in out:
            out.append(c)
    return out


def _select_tiles(batch, in_size, out_p, x_item, w_item, out_item,
                  vmem_budget, block_batch):
    # M tile: full batch when it fits in one block, but split into >=2 blocks once the
    # batch is big enough so v7x's second TensorCore gets work on the "parallel" axis.
    if batch <= block_batch:
        tm = batch
        if batch >= 256:
            tm = _round_up((batch + 1) // 2, 16)   # 16-row rounding: bf16 sublane packing
    else:
        tm = _round_up(block_batch, 16)

    # K tiles must divide in_size exactly (a ragged K block would pollute the
    # accumulator); N tiles must divide the lane-padded out_p (128 always divides).
    tk_cands = _divisor_tiles(in_size, (2048, 1024, 512, 256, 128))
    tn_cands = _divisor_tiles(out_p, (2048, 1024, 512, 256, 128))
    tk, tn = tk_cands[0], tn_cands[0]

    def needed(tm_, tn_, tk_):
        return (2 * tm_ * tk_ * x_item        # x tiles, double-buffered
                + 2 * tk_ * tn_ * w_item      # fused-weight tiles, double-buffered
                + 2 * 8 * tn_ * 4             # bias tile (rounds to 8 sublanes), f32
                + 2 * tm_ * tn_ * out_item    # output tiles, double-buffered
                + tm_ * tn_ * 4)              # f32 accumulator scratch

    # Shrink until it fits: N first (bounds the resident weight footprint — critical on
    # v7x's 64 MiB VMEM), then K, then M.
    ti_n = ti_k = 0
    while needed(tm, tn, tk) > vmem_budget:
        if ti_n + 1 < len(tn_cands):
            ti_n += 1
            tn = tn_cands[ti_n]
        elif ti_k + 1 < len(tk_cands):
            ti_k += 1
            tk = tk_cands[ti_k]
        elif tm > 16:
            tm = max(16, _round_up(tm // 2, 16))
        else:
            break
    return tm, tn, tk, needed(tm, tn, tk)


# ----------------------------- forward -----------------------------------------------
def simple_classifier_forward(x, w_fused_p, b_fused_p, out_size,
                              *, block_batch=512, out_dtype=None):
    """y = simple_classifier(x) as a single MXU pass: x @ W_fused + b_fused.

    x:          (batch, in_size) float array (cast to the weight dtype in-kernel)
    w_fused_p:  (in_size, out_p) from prepare_fused_params (out_p is 128-padded)
    b_fused_p:  (1, out_p) float32
    """
    batch, in_size = x.shape
    in_w, out_p = w_fused_p.shape
    assert in_w == in_size, "x / fused-weight shape mismatch"
    out_dtype = x.dtype if out_dtype is None else out_dtype
    # TODO(synk): emit bf16 output (out_dtype=jnp.bfloat16) when downstream tolerates
    # it — halves writeback traffic in the memory-bound regime.

    x_item = jnp.dtype(x.dtype).itemsize
    w_item = jnp.dtype(w_fused_p.dtype).itemsize
    out_item = jnp.dtype(out_dtype).itemsize

    vmem_ceiling = _vmem_ceiling_bytes()
    tm, tn, tk, vmem_needed = _select_tiles(
        batch, in_size, out_p, x_item, w_item, out_item,
        vmem_budget=vmem_ceiling, block_batch=block_batch)
    vmem_limit = int(min(vmem_ceiling, max(vmem_needed + vmem_needed // 4, 8 << 20)))

    grid = (pl.cdiv(batch, tm), out_p // tn, in_size // tk)

    cost = pl.CostEstimate(
        flops=2 * batch * in_size * out_p,
        transcendentals=0,
        bytes_accessed=(batch * in_size * x_item        # x read
                        + in_size * out_p * w_item      # fused weight read
                        + out_p * 4                     # fused bias read
                        + batch * out_p * out_item),    # output write
    )

    y_p = pl.pallas_call(
        _fused_affine_kernel,
        out_shape=jax.ShapeDtypeStruct((batch, out_p), out_dtype),
        grid=grid,
        in_specs=[
            pl.BlockSpec((tm, tk), lambda i, j, k: (i, k)),   # x: tiled over (batch, K)
            pl.BlockSpec((tk, tn), lambda i, j, k: (k, j)),   # W_fused: constant over i
            pl.BlockSpec((1, tn), lambda i, j, k: (0, j)),    # b_fused (f32): constant
        ],
        out_specs=pl.BlockSpec((tm, tn), lambda i, j, k: (i, j)),
        scratch_shapes=[pltpu.VMEM((tm, tn), jnp.float32)],   # f32 accumulator
        compiler_params=pltpu.CompilerParams(
            dimension_semantics=("parallel", "parallel", "arbitrary"),
            vmem_limit_bytes=vmem_limit,
        ),
        cost_estimate=cost,
    )(x, w_fused_p, b_fused_p)

    # Only the lane padding needs slicing off (batch is never padded).
    return y_p[:, :out_size]


# ----------------------------- init & self-test ---------------------------------------
def init_params(key, input_size, hidden_size, output_size, dtype=jnp.float32):
    """Deterministic init mimicking nn.Linear's U(-1/sqrt(fan_in), 1/sqrt(fan_in)).
    Weights are returned already transposed to (in, out)."""
    ks = jax.random.split(key, 6)

    def linear(kw, kb, fan_in, fan_out):
        bound = 1.0 / jnp.sqrt(jnp.asarray(fan_in, dtype))
        w = jax.random.uniform(kw, (fan_in, fan_out), dtype, -bound, bound)
        b = jax.random.uniform(kb, (1, fan_out), dtype, -bound, bound)
        return w, b

    w1, b1 = linear(ks[0], ks[1], input_size, hidden_size)
    w2, b2 = linear(ks[2], ks[3], hidden_size, hidden_size)
    w3, b3 = linear(ks[4], ks[5], hidden_size, output_size)
    return w1, b1, w2, b2, w3, b3


if __name__ == "__main__":
    input_size, hidden_size, output_size = 32, 32, 16
    batch = 8

    key = jax.random.PRNGKey(0)
    kx, kp = jax.random.split(key)
    x = jax.random.normal(kx, (batch, input_size), jnp.float32)
    w1, b1, w2, b2, w3, b3 = init_params(kp, input_size, hidden_size, output_size)

    # Hoisted: fold + pad + cast happen ONCE, not per forward call.
    w_fused_p, b_fused_p, out_size = prepare_fused_params(
        w1, b1, w2, b2, w3, b3, compute_dtype=jnp.bfloat16)
    jax.block_until_ready((w_fused_p, b_fused_p))

    y = simple_classifier_forward(x, w_fused_p, b_fused_p, out_size)
    y = jax.block_until_ready(y)

    # Reference: the module's forward (linear1 -> linear2 -> linear3, NO activation),
    # in pure f32 JAX.
    ref = ((x @ w1 + b1) @ w2 + b2) @ w3 + b3

    assert y.shape == (batch, output_size)
    assert y.dtype == x.dtype
    err = float(jnp.max(jnp.abs(y - ref)))
    # Tolerance sized for a bf16 fused weight with f32 accumulation over K=32.
    assert jnp.allclose(y, ref, atol=2e-2, rtol=2e-2), f"max abs err {err}"

    print("KERNEL_OK")
</pallas_src>

<mosaic_0001>
module attributes {stable_mosaic.version = 11 : i64} {
  func.func @_fused_affine_kernel(%arg0: i32, %arg1: i32, %arg2: i32, %arg3: memref<8x32xf32, #tpu.memory_space<vmem>>, %arg4: memref<32x128xbf16, #tpu.memory_space<vmem>>, %arg5: memref<1x128xf32, #tpu.memory_space<vmem>>, %arg6: memref<8x128xf32, #tpu.memory_space<vmem>>, %arg7: memref<8x128xf32, #tpu.memory_space<vmem>>) attributes {dimension_semantics = [#tpu.dimension_semantics<parallel>, #tpu.dimension_semantics<parallel>, #tpu.dimension_semantics<arbitrary>], iteration_bounds = array<i64: 1, 1, 1>, scalar_prefetch = 0 : i64, scratch_operands = 1 : i64, tpu.core_type = #tpu.core_type<tc>, window_params = [{transform_indices = @transform_0, window_bounds = array<i64: 8, 32>}, {transform_indices = @transform_1, window_bounds = array<i64: 32, 128>}, {transform_indices = @transform_2, window_bounds = array<i64: 1, 128>}, {transform_indices = @transform_3, window_bounds = array<i64: 8, 128>}]} {
    %c0_i32 = arith.constant 0 : i32
    %0 = arith.cmpi eq, %arg2, %c0_i32 : i32
    %1 = arith.extui %0 : i1 to i32
    %c0_i32_0 = arith.constant 0 : i32
    %2 = arith.cmpi ne, %1, %c0_i32_0 : i32
    scf.if %2 {
      %cst_10 = arith.constant 0.000000e+00 : f32
      %13 = vector.broadcast %cst_10 : f32 to vector<8x128xf32>
      %c0_11 = arith.constant 0 : index
      %c0_12 = arith.constant 0 : index
      %14 = vector.load %arg7[%c0_11, %c0_12] : memref<8x128xf32, #tpu.memory_space<vmem>>, vector<8x128xf32>
      tpu.vector_store %arg7[%c0_11, %c0_12], %13 {strides = array<i32>} : memref<8x128xf32, #tpu.memory_space<vmem>>, vector<8x128xf32>,
    } else {
    }
    %c0 = arith.constant 0 : index
    %c0_1 = arith.constant 0 : index
    %3 = vector.load %arg7[%c0, %c0_1] : memref<8x128xf32, #tpu.memory_space<vmem>>, vector<8x128xf32>
    %c0_2 = arith.constant 0 : index
    %c0_3 = arith.constant 0 : index
    %4 = vector.load %arg3[%c0_2, %c0_3] : memref<8x32xf32, #tpu.memory_space<vmem>>, vector<8x32xf32>
    %5 = arith.truncf %4 : vector<8x32xf32> to vector<8x32xbf16>
    %c0_4 = arith.constant 0 : index
    %c0_5 = arith.constant 0 : index
    %6 = vector.load %arg4[%c0_4, %c0_5] : memref<32x128xbf16, #tpu.memory_space<vmem>>, vector<32x128xbf16>
    %cst = arith.constant dense<0.000000e+00> : vector<8x128xf32>
    %7 = tpu.matmul %5, %6, %cst {dimension_numbers = #tpu.dot_dimension_numbers<[1], [0], [0], [1], [0, 0, 1, 1], [], []>} : vector<8x32xbf16>, vector<32x128xbf16>, vector<8x128xf32> -> vector<8x128xf32>
    %8 = arith.addf %3, %7 : vector<8x128xf32>
    %c0_6 = arith.constant 0 : index
    %c0_7 = arith.constant 0 : index
    %9 = vector.load %arg7[%c0_6, %c0_7] : memref<8x128xf32, #tpu.memory_space<vmem>>, vector<8x128xf32>
    tpu.vector_store %arg7[%c0_6, %c0_7], %8 {strides = array<i32>} : memref<8x128xf32, #tpu.memory_space<vmem>>, vector<8x128xf32>,
    %c0_i32_8 = arith.constant 0 : i32
    %10 = arith.cmpi eq, %arg2, %c0_i32_8 : i32
    %11 = arith.extui %10 : i1 to i32
    %c0_i32_9 = arith.constant 0 : i32
    %12 = arith.cmpi ne, %11, %c0_i32_9 : i32
    scf.if %12 {
      %c0_10 = arith.constant 0 : index
      %c0_11 = arith.constant 0 : index
      %13 = vector.load %arg7[%c0_10, %c0_11] : memref<8x128xf32, #tpu.memory_space<vmem>>, vector<8x128xf32>
      %c0_12 = arith.constant 0 : index
      %c0_13 = arith.constant 0 : index
      %14 = vector.load %arg5[%c0_12, %c0_13] : memref<1x128xf32, #tpu.memory_space<vmem>>, vector<1x128xf32>
      %15 = vector.broadcast %14 : vector<1x128xf32> to vector<8x128xf32>
      %16 = arith.addf %13, %15 : vector<8x128xf32>
      %c0_14 = arith.constant 0 : index
      %c0_15 = arith.constant 0 : index
      %17 = vector.load %arg6[%c0_14, %c0_15] : memref<8x128xf32, #tpu.memory_space<vmem>>, vector<8x128xf32>
      tpu.vector_store %arg6[%c0_14, %c0_15], %16 {strides = array<i32>} : memref<8x128xf32, #tpu.memory_space<vmem>>, vector<8x128xf32>,
    } else {
    }
    return
  }
  func.func @transform_0(%arg0: i32, %arg1: i32, %arg2: i32) -> (i32, i32) {
    %c0_i32 = arith.constant 0 : i32
    return %arg0, %arg2 : i32, i32
  }
  func.func @transform_1(%arg0: i32, %arg1: i32, %arg2: i32) -> (i32, i32) {
    %c0_i32 = arith.constant 0 : i32
    return %arg2, %arg1 : i32, i32
  }
  func.func @transform_2(%arg0: i32, %arg1: i32, %arg2: i32) -> (i32, i32) {
    %c0_i32 = arith.constant 0 : i32
    %c0_i32_0 = arith.constant 0 : i32
    return %c0_i32, %arg1 : i32, i32
  }
  func.func @transform_3(%arg0: i32, %arg1: i32, %arg2: i32) -> (i32, i32) {
    %c0_i32 = arith.constant 0 : i32
    return %arg0, %arg1 : i32, i32
  }
}

</mosaic_0001>

<bundles_post_ra>
// kernel: tpu_custom_call.1
= control target key start
LH: loop header
LB: loop body
LE: loop exit
PB: predicated region body
PF: predicated region fallthrough
CT: control target
= control target key end

     0   :  { %8 = vsyncpa [#allocation4], 0  ;;  %s249_s0 = inlined_call_operand.hbm [shape: f32[8,32], index: 0, kind: input, shape index: {}]   ;;  %s250_s1 = inlined_call_operand.hbm [shape: bf16[32,128], index: 1, kind: input, shape index: {}]   ;;  %s251_s2 = inlined_call_operand.vmem [shape: f32[1,128], index: 2, kind: input, shape index: {}]   ;;  %s252_s3 = inlined_call_operand.hbm [shape: f32[8,128], index: 3, kind: output, shape index: {}]  }
   0x1   :  { %9 = vsyncpa [#allocation7], 0 }
   0x2   :  { %10 = vsyncpa [#allocation5], 0  ;;  %s16_s14 = sshll.u32 %s249_s0, 4  ;;  %s212_s15 = smov [#allocation3]   ;;  %s17_s14 = int_to_ptr.hbm [resolvable:$true] %s16_s14 }
   0x3   :  { %s18_s16 = sshll.u32 %s212_s15, 4  ;;  %s26_s19 = sshll.u32 %s250_s1, 4  ;;  %s19_s16 = int_to_ptr.vmem [resolvable:$true] %s18_s16  ;;  %s27_s19 = int_to_ptr.hbm [resolvable:$true] %s26_s19 }
   0x4   :  { %21 = dma.hbm_to_vmem [thread:$0]  %s17_s14, 128, %s19_s16, [#allocation4]  }
   0x5   :  { %s213_s20 = smov [#allocation6]   ;;  %s214_s22 = smov 64  }
   0x6   :  { %s28_s21 = sshll.u32 %s213_s20, 4  ;;  %s215_s23 = smov 4   ;;  %s29_s21 = int_to_ptr.vmem [resolvable:$true] %s28_s21 }
   0x7   :  { %34 = dma.hbm_to_vmem [thread:$0]  %s27_s19, 256, %s29_s21, [#allocation7], %s214_s22, %s214_s22, %s215_s23  }
   0x8   :  { %206 = dma.done.wait [#allocation4], 128  }
   0x9   :  { %207 = vsyncadd [#allocation4], 4294967168 }
   0xa   :  { %208 = dma.done.wait [#allocation7], 256  }
   0xb   :  { %209 = vsyncadd [#allocation7], 4294967040  ;;  %v127_v0 = vld [vmem:[#allocation6 + $0x8] sm:$0xff]  ;;  %v126_v1 = vld [vmem:[#allocation6] sm:$0xff]  ;;  %vm70_vm0 = vcmask 261120   ;;  %s216_s24 = smov [#allocation8]  }
   0xc   :  { %80 = vmatpush.bf16.msra.mxu0 %v127_v0  ;;  %v52_v2 = vld [vmem:[#allocation3] sm:$0xff]  ;;  %s104_s25 = sshll.u32 %s216_s24, 4  ;;  %s106_s28 = sshll.u32 %s252_s3, 4  ;;  %s105_s25 = int_to_ptr.vmem [resolvable:$true] %s104_s25  ;;  %s107_s28 = int_to_ptr.hbm [resolvable:$true] %s106_s28 }
   0xd   :  { %v53_v3 = vpack.c.bf16 %v52_v2, %v52_v2  ;;  %v133_v4 = vld [vmem:[%s251_s2] ss:$0 sm:$0xff] }
  0x10   :  { %81 = vmatpush.bf16.msra.mxu0 %v126_v1 }
  0x13   :  { %125 = vmatmul.msk.bf16.vlgmr.msra.gmra.mxu0 %vm70_vm0, %v53_v3 }
  0x90   :  { %v83_v5 = vpop.f32.mrf.mxu0 }
  0x91   :  { %v97_v6 = vadd.f32 %v133_v4, %v83_v5 }
  0x93   :  { %98 = vst [vmem:[#allocation8] sm:$0xff] %v97_v6 }
  0x94   :  { %109 = dma.vmem_to_hbm [thread:$0]  %s105_s25, 128, %s107_s28, [#allocation5]  }
  0x98   :  { %v85_v7 = vpop.f32.mrf.mxu0 }
  0x99   :  { %210 = dma.done.wait [#allocation5], 128  }
  0x9a   :  { %211 = vsyncadd [#allocation5], 4294967168 }
  0x9b   :  { %114 = vsyncpa [#allocation4], 1 }
  0x9c   :  { %115 = vsyncpa [#allocation7], 1 }
  0x9d   :  { %116 = vsyncpa [#allocation5], 1 }

</bundles_post_ra>
